<compile_context>
chip_gen: v5e
topology: v5e:2x2
jax: 0.10.0
libtpu: 0.0.40
codegen_flags: <defaults>
</compile_context>

<pallas_src>
import functools
import math
from typing import NamedTuple

import jax
import jax.numpy as jnp
from jax.experimental import pallas as pl
from jax.experimental.pallas import tpu as pltpu


ARCHI = (16, 32, 32, 8)   # archi[0] must equal C*H*W of the input
T_STEPS = 5
MBS = 2

_LANE = 128      # f32 lane width
_SUBLANE = 8     # f32 sublane count
_UNROLL_LIMIT = 8

_VMEM_SPEC = pl.BlockSpec(memory_space=pltpu.MemorySpace.VMEM)


def _round_up(v, m):
    return ((v + m - 1) // m) * m


class _Meta(NamedTuple):
    offs: tuple
    total: int
    in_dim: int
    in_pad: int
    b_pad: int
    f_pad: int
    mbs: int


class Prepared(NamedTuple):
    M_p: jax.Array        # (f_pad, f_pad) combined per-step update matrix
    W0T_p: jax.Array      # (in_pad, f_pad) padded W_0^T (feedforward from x)
    c_base_p: jax.Array   # (b_pad, f_pad) broadcast biases (zero in padding)
    meta: _Meta


# --------------------------------------------------------------------------
# Kernels
# --------------------------------------------------------------------------
def _iterate(n, M, c, steps):
    """n <- tanh(n @ M + c), `steps` times. Strictly serial; no grid over T."""
    def step(nn):
        return jnp.tanh(
            jnp.dot(nn, M, preferred_element_type=jnp.float32) + c)

    if steps <= _UNROLL_LIMIT:
        for _ in range(steps):
            n = step(n)
        return n
    return jax.lax.fori_loop(0, steps, lambda _, nn: step(nn), n, unroll=True)


def _make_kernel_zero_init(T):
    """Fast path for zero-initialized neurons (module's init_neurons)."""

    def kernel(x_ref, w0t_ref, m_ref, cb_ref, out_ref):
        # Loop-invariant c = x @ W0^T + biases, built once in-kernel.
        c = jnp.dot(x_ref[...], w0t_ref[...],
                    preferred_element_type=jnp.float32) + cb_ref[...]
        # n0 == 0  =>  first update is exactly tanh(c); skip the zero matmul.
        n = jnp.tanh(c)
        if T > 1:
            M = m_ref[...]            # 16 vregs at f_pad=128; hoist once
            n = _iterate(n, M, c, T - 1)
        out_ref[...] = n

    return kernel


def _make_kernel_general(T):
    """General path for an arbitrary starting neuron state."""

    def kernel(n_ref, x_ref, w0t_ref, m_ref, cb_ref, out_ref):
        c = jnp.dot(x_ref[...], w0t_ref[...],
                    preferred_element_type=jnp.float32) + cb_ref[...]
        M = m_ref[...]
        out_ref[...] = _iterate(n_ref[...], M, c, T)

    return kernel


# --------------------------------------------------------------------------
# One-time (per weight-set) preparation — hoisted out of the per-call path.
# --------------------------------------------------------------------------
def prepare_params(Ws, bs, lats, mbs):
    L = len(Ws)
    sizes = [int(w.shape[0]) for w in Ws]          # archi[1:]
    in_dim = int(Ws[0].shape[1])                   # archi[0]
    offs = [0]
    for s in sizes:
        offs.append(offs[-1] + s)
    total = offs[-1]

    b_pad = _round_up(max(mbs, 1), _SUBLANE)
    f_pad = _round_up(total, _LANE)
    in_pad = _round_up(in_dim, _LANE)

    # Combined per-step update matrix (zero-padded to one 128-wide MXU tile).
    M = jnp.zeros((f_pad, f_pad), jnp.float32)
    for k in range(L):
        # lateral: n_k @ (lat_k + lat_k^T)  (symmetrized once, here)
        M = M.at[offs[k]:offs[k + 1], offs[k]:offs[k + 1]].set(
            (lats[k] + lats[k].T).astype(jnp.float32))
        if k >= 1:
            # feedforward: n_{k-1} @ W_k^T  (transposed once, here)
            M = M.at[offs[k - 1]:offs[k], offs[k]:offs[k + 1]].set(
                Ws[k].T.astype(jnp.float32))
        if k < L - 1:
            # feedback: n_{k+1} @ W_{k+1}
            M = M.at[offs[k + 1]:offs[k + 2], offs[k]:offs[k + 1]].set(
                Ws[k + 1].astype(jnp.float32))

    # Padded W_0^T (feedforward term from x, applied in-kernel once per call).
    W0T = jnp.zeros((in_pad, f_pad), jnp.float32)
    W0T = W0T.at[:in_dim, :sizes[0]].set(Ws[0].T.astype(jnp.float32))

    # Broadcast bias slab (zero in all padded columns).
    bias_row = jnp.concatenate(
        [jnp.asarray(b, jnp.float32).reshape(-1) for b in bs], axis=0)
    c_base = jnp.zeros((b_pad, f_pad), jnp.float32)
    c_base = c_base.at[:, :total].set(jnp.broadcast_to(bias_row, (b_pad, total)))

    meta = _Meta(offs=tuple(offs), total=total, in_dim=in_dim, in_pad=in_pad,
                 b_pad=b_pad, f_pad=f_pad, mbs=int(mbs))
    return Prepared(M_p=jax.device_put(M), W0T_p=jax.device_put(W0T),
                    c_base_p=jax.device_put(c_base), meta=meta)


# --------------------------------------------------------------------------
# Per-call forwards (jitted; only flatten/pad x — everything else is cached).
# --------------------------------------------------------------------------
def _pad_x(x, meta):
    x2d = x.reshape(meta.mbs, -1).astype(jnp.float32)
    return (jnp.zeros((meta.b_pad, meta.in_pad), jnp.float32)
            .at[:meta.mbs, :meta.in_dim].set(x2d))


def _slice_out(out, meta):
    offs = meta.offs
    return [out[:meta.mbs, offs[k]:offs[k + 1]] for k in range(len(offs) - 1)]


@functools.partial(jax.jit, static_argnames=("T", "meta"))
def _forward_zero_jit(x, M_p, W0T_p, c_base_p, T, meta):
    x_p = _pad_x(x, meta)
    out = pl.pallas_call(
        _make_kernel_zero_init(T),
        out_shape=jax.ShapeDtypeStruct((meta.b_pad, meta.f_pad), jnp.float32),
        in_specs=[_VMEM_SPEC] * 4,
        out_specs=_VMEM_SPEC,
    )(x_p, W0T_p, M_p, c_base_p)
    return _slice_out(out, meta)


@functools.partial(jax.jit, static_argnames=("T", "meta"))
def _forward_general_jit(x, neurons, M_p, W0T_p, c_base_p, T, meta):
    x_p = _pad_x(x, meta)
    n0 = jnp.concatenate([n.astype(jnp.float32) for n in neurons], axis=1)
    n0_p = (jnp.zeros((meta.b_pad, meta.f_pad), jnp.float32)
            .at[:meta.mbs, :meta.total].set(n0))
    out = pl.pallas_call(
        _make_kernel_general(T),
        out_shape=jax.ShapeDtypeStruct((meta.b_pad, meta.f_pad), jnp.float32),
        in_specs=[_VMEM_SPEC] * 5,
        out_specs=_VMEM_SPEC,
        input_output_aliases={0: 0},   # n0 slab is fresh per call -> reuse buffer
    )(n0_p, x_p, W0T_p, M_p, c_base_p)
    return _slice_out(out, meta)


def lat_p_mlp_forward(x, prepared, T, neurons=None):
    """Forward pass. neurons=None means the module's zero init_neurons state."""
    meta = prepared.meta
    sizes = [meta.offs[k + 1] - meta.offs[k] for k in range(len(meta.offs) - 1)]
    if T <= 0:
        if neurons is None:
            return [jnp.zeros((meta.mbs, s), jnp.float32) for s in sizes]
        return [jnp.asarray(n, jnp.float32) for n in neurons]
    if neurons is None:
        return _forward_zero_jit(x, prepared.M_p, prepared.W0T_p,
                                 prepared.c_base_p, T=T, meta=meta)
    return _forward_general_jit(x, tuple(neurons), prepared.M_p, prepared.W0T_p,
                                prepared.c_base_p, T=T, meta=meta)


# --------------------------------------------------------------------------
# Plain-JAX reference mirroring the PyTorch autograd fixed-point update.
# --------------------------------------------------------------------------
def reference_forward(x, neurons, Ws, bs, lats, T):
    hp = jax.lax.Precision.HIGHEST
    x2d = x.reshape(x.shape[0], -1).astype(jnp.float32)
    L = len(Ws)
    neurons = list(neurons)
    for _ in range(T):
        layers = [x2d] + neurons
        grads = []
        for k in range(L):
            g = jnp.dot(layers[k], Ws[k].T, precision=hp) + bs[k]
            if k < L - 1:
                g = g + jnp.dot(neurons[k + 1], Ws[k + 1], precision=hp)
            g = g + jnp.dot(neurons[k], lats[k] + lats[k].T, precision=hp)
            grads.append(g)
        neurons = [jnp.tanh(g) for g in grads]  # MSE criterion -> tanh on last too
    return neurons


def init_params(key, archi):
    """PyTorch-style uniform(-1/sqrt(fan_in), +1/sqrt(fan_in)) init."""
    L = len(archi) - 1
    Ws, bs, lats = [], [], []
    for idx in range(L):
        fan_in, fan_out = archi[idx], archi[idx + 1]
        bound = 1.0 / math.sqrt(fan_in)
        key, kw, kb = jax.random.split(key, 3)
        Ws.append(jax.random.uniform(kw, (fan_out, fan_in), jnp.float32,
                                     -bound, bound))
        bs.append(jax.random.uniform(kb, (fan_out,), jnp.float32,
                                     -bound, bound))
    for idx in range(1, len(archi)):
        n = archi[idx]
        bound = 1.0 / math.sqrt(n)
        key, kl = jax.random.split(key)
        lats.append(jax.random.uniform(kl, (n, n), jnp.float32, -bound, bound))
    return Ws, bs, lats


if __name__ == "__main__":
    key = jax.random.PRNGKey(0)
    key, kx = jax.random.split(key)

    # x is NCHW-like: (batch=2, C=1, H=4, W=4) -> flattened feature dim 16 = ARCHI[0]
    x = jax.random.normal(kx, (MBS, 1, 4, 4), dtype=jnp.float32)
    Ws, bs, lats = init_params(key, ARCHI)

    # One-time, per weight-set preparation (hoisted out of the per-call path).
    prepared = prepare_params(Ws, bs, lats, MBS)

    # --- default usage: zero-initialized neurons (init_neurons) -> fast path ---
    out_zero = lat_p_mlp_forward(x, prepared, T_STEPS)          # neurons=None
    out_zero = jax.block_until_ready(out_zero)

    zero_neurons = [jnp.zeros((MBS, sz), jnp.float32) for sz in ARCHI[1:]]
    ref_zero = reference_forward(x, zero_neurons, Ws, bs, lats, T_STEPS)
    for o, r in zip(out_zero, ref_zero):
        assert o.shape == r.shape and o.dtype == r.dtype
        assert jnp.allclose(o, r, rtol=1e-5, atol=1e-5), "zero-init mismatch"

    # --- general usage: arbitrary starting neuron state -> aliased general path ---
    key, *nkeys = jax.random.split(key, len(ARCHI))
    rand_neurons = [0.1 * jax.random.normal(k, (MBS, sz), jnp.float32)
                    for k, sz in zip(nkeys, ARCHI[1:])]
    out_gen = lat_p_mlp_forward(x, prepared, T_STEPS, neurons=rand_neurons)
    out_gen = jax.block_until_ready(out_gen)

    ref_gen = reference_forward(x, rand_neurons, Ws, bs, lats, T_STEPS)
    for o, r in zip(out_gen, ref_gen):
        assert o.shape == r.shape and o.dtype == r.dtype
        assert jnp.allclose(o, r, rtol=1e-5, atol=1e-5), "general-path mismatch"

    print("KERNEL_OK")
</pallas_src>

<mosaic_0001>
module attributes {stable_mosaic.version = 11 : i64} {
  func.func @kernel(%arg0: memref<8x128xf32, #tpu.memory_space<vmem>>, %arg1: memref<128x128xf32, #tpu.memory_space<vmem>>, %arg2: memref<128x128xf32, #tpu.memory_space<vmem>>, %arg3: memref<8x128xf32, #tpu.memory_space<vmem>>, %arg4: memref<8x128xf32, #tpu.memory_space<vmem>>) attributes {dimension_semantics = [], scalar_prefetch = 0 : i64, scratch_operands = 0 : i64, tpu.core_type = #tpu.core_type<tc>} {
    %c0 = arith.constant 0 : index
    %c0_0 = arith.constant 0 : index
    %0 = vector.load %arg0[%c0, %c0_0] : memref<8x128xf32, #tpu.memory_space<vmem>>, vector<8x128xf32>
    %c0_1 = arith.constant 0 : index
    %c0_2 = arith.constant 0 : index
    %1 = vector.load %arg1[%c0_1, %c0_2] : memref<128x128xf32, #tpu.memory_space<vmem>>, vector<128x128xf32>
    %cst = arith.constant dense<0.000000e+00> : vector<8x128xf32>
    %2 = tpu.matmul %0, %1, %cst {dimension_numbers = #tpu.dot_dimension_numbers<[1], [0], [0], [1], [0, 0, 1, 1], [], []>} : vector<8x128xf32>, vector<128x128xf32>, vector<8x128xf32> -> vector<8x128xf32>
    %c0_3 = arith.constant 0 : index
    %c0_4 = arith.constant 0 : index
    %3 = vector.load %arg3[%c0_3, %c0_4] : memref<8x128xf32, #tpu.memory_space<vmem>>, vector<8x128xf32>
    %4 = arith.addf %2, %3 : vector<8x128xf32>
    %5 = math.tanh %4 : vector<8x128xf32>
    %c0_5 = arith.constant 0 : index
    %c0_6 = arith.constant 0 : index
    %6 = vector.load %arg2[%c0_5, %c0_6] : memref<128x128xf32, #tpu.memory_space<vmem>>, vector<128x128xf32>
    %cst_7 = arith.constant dense<0.000000e+00> : vector<8x128xf32>
    %7 = tpu.matmul %5, %6, %cst_7 {dimension_numbers = #tpu.dot_dimension_numbers<[1], [0], [0], [1], [0, 0, 1, 1], [], []>} : vector<8x128xf32>, vector<128x128xf32>, vector<8x128xf32> -> vector<8x128xf32>
    %8 = arith.addf %7, %4 : vector<8x128xf32>
    %9 = math.tanh %8 : vector<8x128xf32>
    %cst_8 = arith.constant dense<0.000000e+00> : vector<8x128xf32>
    %10 = tpu.matmul %9, %6, %cst_8 {dimension_numbers = #tpu.dot_dimension_numbers<[1], [0], [0], [1], [0, 0, 1, 1], [], []>} : vector<8x128xf32>, vector<128x128xf32>, vector<8x128xf32> -> vector<8x128xf32>
    %11 = arith.addf %10, %4 : vector<8x128xf32>
    %12 = math.tanh %11 : vector<8x128xf32>
    %cst_9 = arith.constant dense<0.000000e+00> : vector<8x128xf32>
    %13 = tpu.matmul %12, %6, %cst_9 {dimension_numbers = #tpu.dot_dimension_numbers<[1], [0], [0], [1], [0, 0, 1, 1], [], []>} : vector<8x128xf32>, vector<128x128xf32>, vector<8x128xf32> -> vector<8x128xf32>
    %14 = arith.addf %13, %4 : vector<8x128xf32>
    %15 = math.tanh %14 : vector<8x128xf32>
    %cst_10 = arith.constant dense<0.000000e+00> : vector<8x128xf32>
    %16 = tpu.matmul %15, %6, %cst_10 {dimension_numbers = #tpu.dot_dimension_numbers<[1], [0], [0], [1], [0, 0, 1, 1], [], []>} : vector<8x128xf32>, vector<128x128xf32>, vector<8x128xf32> -> vector<8x128xf32>
    %17 = arith.addf %16, %4 : vector<8x128xf32>
    %18 = math.tanh %17 : vector<8x128xf32>
    %c0_11 = arith.constant 0 : index
    %c0_12 = arith.constant 0 : index
    %19 = vector.load %arg4[%c0_11, %c0_12] : memref<8x128xf32, #tpu.memory_space<vmem>>, vector<8x128xf32>
    tpu.vector_store %arg4[%c0_11, %c0_12], %18 {strides = array<i32>} : memref<8x128xf32, #tpu.memory_space<vmem>>, vector<8x128xf32>,
    return
  }
}

</mosaic_0001>

<bundles_post_ra>
// kernel: _forward_zero_jit.1
= control target key start
LH: loop header
LB: loop body
LE: loop exit
PB: predicated region body
PF: predicated region fallthrough
CT: control target
= control target key end

     0   :  { %9 = vsyncpa [#allocation3], 0  ;;  %s323_s0 = inlined_call_operand.vmem [shape: f32[8,128], index: 0, kind: input, shape index: {}]   ;;  %s324_s1 = inlined_call_operand.hbm [shape: f32[128,128], index: 1, kind: input, shape index: {}]   ;;  %s325_s2 = inlined_call_operand.hbm [shape: f32[128,128], index: 2, kind: input, shape index: {}]   ;;  %s326_s3 = inlined_call_operand.vmem [shape: f32[8,128], index: 3, kind: input, shape index: {}]   ;;  %s327_s4 = inlined_call_operand.vmem [shape: f32[8,128], index: 4, kind: output, shape index: {}]  }
   0x1   :  { %s17_s17 = sshll.u32 %s324_s1, 4  ;;  %s18_s17 = int_to_ptr.hbm [resolvable:$true] %s17_s17 }
   0x2   :  { %10 = vsyncpa [#allocation5], 0  ;;  %s261_s18 = smov [#allocation2]   ;;  %s30_s22 = sshll.u32 %s325_s2, 4  ;;  %s31_s22 = int_to_ptr.hbm [resolvable:$true] %s30_s22 }
   0x3   :  { %s19_s19 = sshll.u32 %s261_s18, 4  ;;  %s262_s23 = smov 128   ;;  %s20_s19 = int_to_ptr.vmem [resolvable:$true] %s19_s19 }
   0x4   :  { %s263_s24 = smov 8   ;;  %s264_s25 = smov [#allocation4]  }
   0x5   :  { %25 = dma.hbm_to_vmem [thread:$0]  %s18_s17, 2048, %s20_s19, [#allocation3], %s262_s23, %s262_s23, %s263_s24  }
   0x6   :  { %s32_s26 = sshll.u32 %s264_s25, 4  ;;  %s33_s26 = int_to_ptr.vmem [resolvable:$true] %s32_s26 }
   0x7   :  { %38 = dma.hbm_to_vmem [thread:$0]  %s31_s22, 2048, %s33_s26, [#allocation5], %s262_s23, %s262_s23, %s263_s24  }
   0x8   :  { %257 = dma.done.wait [#allocation3], 2048  }
   0x9   :  { %258 = vsyncadd [#allocation3], 4294965248 }
   0xa   :  { %259 = dma.done.wait [#allocation5], 2048  }
   0xb   :  { %260 = vsyncadd [#allocation5], 4294965248  ;;  %v65_v0 = vld [vmem:[#allocation2 + $0x78] sm:$0xff]  ;;  %v64_v1 = vld [vmem:[#allocation2 + $0x70] sm:$0xff] }
   0xc   :  { %67 = vmatpush.msra.mxu0 %v65_v0  ;;  %v63_v2 = vld [vmem:[#allocation2 + $0x68] sm:$0xff]  ;;  %v62_v3 = vld [vmem:[#allocation2 + $0x60] sm:$0xff]  ;;  %v296_v4 = vld [vmem:[#allocation4 + $0x78] sm:$0xff] }
   0xd   :  { %v61_v5 = vld [vmem:[#allocation2 + $0x58] sm:$0xff]  ;;  %104 = vmatpush.msra.mxu1 %v296_v4  ;;  %v299_v6 = vld [vmem:[#allocation4 + $0x70] sm:$0xff]  ;;  %125 = vmatpush.msra.mxu2 %v296_v4  ;;  %v302_v7 = vld [vmem:[#allocation4 + $0x68] sm:$0xff] }
   0xe   :  { %68 = vmatpush.msra.mxu0 %v64_v1  ;;  %146 = vmatpush.msra.mxu3 %v296_v4  ;;  %v60_v8 = vld [vmem:[#allocation2 + $0x50] sm:$0xff]  ;;  %v100_v9 = vld [vmem:[#allocation4 + $0x60] sm:$0xff]  ;;  %v59_v10 = vld [vmem:[#allocation2 + $0x48] sm:$0xff] }
   0xf   :  { %105 = vmatpush.msra.mxu1 %v299_v6  ;;  %126 = vmatpush.msra.mxu2 %v299_v6  ;;  %v99_v11 = vld [vmem:[#allocation4 + $0x58] sm:$0xff]  ;;  %v58_v12 = vld [vmem:[#allocation2 + $0x40] sm:$0xff]  ;;  %v98_v13 = vld [vmem:[#allocation4 + $0x50] sm:$0xff] }
  0x10   :  { %69 = vmatpush.msra.mxu0 %v63_v2  ;;  %147 = vmatpush.msra.mxu3 %v299_v6  ;;  %v57_v14 = vld [vmem:[#allocation2 + $0x38] sm:$0xff]  ;;  %v97_v15 = vld [vmem:[#allocation4 + $0x48] sm:$0xff]  ;;  %v56_v16 = vld [vmem:[#allocation2 + $0x30] sm:$0xff] }
  0x11   :  { %106 = vmatpush.msra.mxu1 %v302_v7  ;;  %127 = vmatpush.msra.mxu2 %v302_v7  ;;  %v96_v17 = vld [vmem:[#allocation4 + $0x40] sm:$0xff]  ;;  %v55_v18 = vld [vmem:[#allocation2 + $0x28] sm:$0xff]  ;;  %v95_v19 = vld [vmem:[#allocation4 + $0x38] sm:$0xff] }
  0x12   :  { %70 = vmatpush.msra.mxu0 %v62_v3  ;;  %148 = vmatpush.msra.mxu3 %v302_v7  ;;  %v54_v20 = vld [vmem:[#allocation2 + $0x20] sm:$0xff]  ;;  %v94_v21 = vld [vmem:[#allocation4 + $0x30] sm:$0xff]  ;;  %v53_v22 = vld [vmem:[#allocation2 + $0x18] sm:$0xff] }
  0x13   :  { %107 = vmatpush.msra.mxu1 %v100_v9  ;;  %128 = vmatpush.msra.mxu2 %v100_v9  ;;  %v93_v23 = vld [vmem:[#allocation4 + $0x28] sm:$0xff]  ;;  %v52_v24 = vld [vmem:[#allocation2 + $0x10] sm:$0xff]  ;;  %v50_v26 = vld [vmem:[#allocation2] sm:$0xff] }
  0x14   :  { %71 = vmatpush.msra.mxu0 %v61_v5  ;;  %149 = vmatpush.msra.mxu3 %v100_v9  ;;  %v51_v25 = vld [vmem:[#allocation2 + $0x8] sm:$0xff]  ;;  %v49_v27 = vld [vmem:[%s323_s0] sm:$0xff]  ;;  %v91_v29 = vld [vmem:[#allocation4 + $0x18] sm:$0xff] }
  0x15   :  { %108 = vmatpush.msra.mxu1 %v99_v11  ;;  %129 = vmatpush.msra.mxu2 %v99_v11  ;;  %v92_v28 = vld [vmem:[#allocation4 + $0x20] sm:$0xff]  ;;  %v90_v30 = vld [vmem:[#allocation4 + $0x10] sm:$0xff]  ;;  %v89_v31 = vld [vmem:[#allocation4 + $0x8] sm:$0xff] }
  0x16   :  { %72 = vmatpush.msra.mxu0 %v60_v8  ;;  %150 = vmatpush.msra.mxu3 %v99_v11  ;;  %v88_v32 = vld [vmem:[#allocation4] sm:$0xff] }
  0x17   :  { %109 = vmatpush.msra.mxu1 %v98_v13  ;;  %130 = vmatpush.msra.mxu2 %v98_v13  ;;  %v66_v33 = vld [vmem:[%s326_s3] sm:$0xff] }
  0x18   :  { %73 = vmatpush.msra.mxu0 %v59_v10  ;;  %151 = vmatpush.msra.mxu3 %v98_v13 }
  0x19   :  { %110 = vmatpush.msra.mxu1 %v97_v15  ;;  %131 = vmatpush.msra.mxu2 %v97_v15 }
  0x1a   :  { %74 = vmatpush.msra.mxu0 %v58_v12  ;;  %152 = vmatpush.msra.mxu3 %v97_v15 }
  0x1b   :  { %111 = vmatpush.msra.mxu1 %v96_v17  ;;  %132 = vmatpush.msra.mxu2 %v96_v17 }
  0x1c   :  { %75 = vmatpush.msra.mxu0 %v57_v14  ;;  %153 = vmatpush.msra.mxu3 %v96_v17 }
  0x1d   :  { %112 = vmatpush.msra.mxu1 %v95_v19  ;;  %133 = vmatpush.msra.mxu2 %v95_v19 }
  0x1e   :  { %76 = vmatpush.msra.mxu0 %v56_v16  ;;  %154 = vmatpush.msra.mxu3 %v95_v19 }
  0x1f   :  { %113 = vmatpush.msra.mxu1 %v94_v21  ;;  %134 = vmatpush.msra.mxu2 %v94_v21 }
  0x20   :  { %77 = vmatpush.msra.mxu0 %v55_v18  ;;  %155 = vmatpush.msra.mxu3 %v94_v21 }
  0x21   :  { %114 = vmatpush.msra.mxu1 %v93_v23  ;;  %135 = vmatpush.msra.mxu2 %v93_v23 }
  0x22   :  { %78 = vmatpush.msra.mxu0 %v54_v20  ;;  %156 = vmatpush.msra.mxu3 %v93_v23 }
  0x23   :  { %115 = vmatpush.msra.mxu1 %v92_v28  ;;  %136 = vmatpush.msra.mxu2 %v92_v28 }
  0x24   :  { %79 = vmatpush.msra.mxu0 %v53_v22  ;;  %157 = vmatpush.msra.mxu3 %v92_v28 }
  0x25   :  { %116 = vmatpush.msra.mxu1 %v91_v29  ;;  %137 = vmatpush.msra.mxu2 %v91_v29 }
  0x26   :  { %80 = vmatpush.msra.mxu0 %v52_v24  ;;  %158 = vmatpush.msra.mxu3 %v91_v29 }
  0x27   :  { %117 = vmatpush.msra.mxu1 %v90_v30  ;;  %138 = vmatpush.msra.mxu2 %v90_v30 }
  0x28   :  { %81 = vmatpush.msra.mxu0 %v51_v25  ;;  %159 = vmatpush.msra.mxu3 %v90_v30 }
  0x29   :  { %118 = vmatpush.msra.mxu1 %v89_v31  ;;  %139 = vmatpush.msra.mxu2 %v89_v31 }
  0x2a   :  { %82 = vmatpush.msra.mxu0 %v50_v26  ;;  %160 = vmatpush.msra.mxu3 %v89_v31 }
  0x2b   :  { %83 = vmatmul.f32.vlgmr.msra.gmra.mxu0 %v49_v27  ;;  %119 = vmatpush.msra.mxu1 %v88_v32 }
  0x2c   :  { %167 = vmatpush.msrb.mxu0 %v296_v4  ;;  %140 = vmatpush.msra.mxu2 %v88_v32 }
  0x2d   :  { %161 = vmatpush.msra.mxu3 %v88_v32 }
  0x2e   :  { %168 = vmatpush.msrb.mxu0 %v299_v6 }
  0x30   :  { %169 = vmatpush.msrb.mxu0 %v302_v7 }
  0x32   :  { %170 = vmatpush.msrb.mxu0 %v100_v9 }
  0x34   :  { %171 = vmatpush.msrb.mxu0 %v99_v11 }
  0x36   :  { %172 = vmatpush.msrb.mxu0 %v98_v13 }
  0x38   :  { %173 = vmatpush.msrb.mxu0 %v97_v15 }
  0x3a   :  { %174 = vmatpush.msrb.mxu0 %v96_v17 }
  0x3c   :  { %175 = vmatpush.msrb.mxu0 %v95_v19 }
  0x3e   :  { %176 = vmatpush.msrb.mxu0 %v94_v21 }
  0x40   :  { %177 = vmatpush.msrb.mxu0 %v93_v23 }
  0x42   :  { %178 = vmatpush.msrb.mxu0 %v92_v28 }
  0x44   :  { %179 = vmatpush.msrb.mxu0 %v91_v29 }
  0x46   :  { %180 = vmatpush.msrb.mxu0 %v90_v30 }
  0x48   :  { %181 = vmatpush.msrb.mxu0 %v89_v31 }
  0x4a   :  { %182 = vmatpush.msrb.mxu0 %v88_v32 }
  0xa8   :  { %v84_v34 = vpop.f32.mrf.mxu0 }
  0xa9   :  { %v85_v35 = vadd.f32 %v84_v34, %v66_v33 }
  0xab   :  { %199 = vtanh.f32 %v85_v35 }
  0xb1   :  { %v200_v36 = vpop.eup %199 }
  0xb2   :  { %120 = vmatmul.f32.vlgmr.msra.gmra.mxu1 %v200_v36 }
 0x12f   :  { %v121_v37 = vpop.f32.mrf.mxu1 }
 0x130   :  { %v122_v38 = vadd.f32 %v121_v37, %v85_v35 }
 0x132   :  { %201 = vtanh.f32 %v122_v38 }
 0x138   :  { %v202_v39 = vpop.eup %201 }
 0x139   :  { %141 = vmatmul.f32.vlgmr.msra.gmra.mxu2 %v202_v39 }
 0x1bc   :  { %v142_v40 = vpop.f32.mrf.mxu2 }
 0x1bd   :  { %v143_v41 = vadd.f32 %v142_v40, %v85_v35 }
 0x1bf   :  { %203 = vtanh.f32 %v143_v41 }
 0x1c5   :  { %v204_v42 = vpop.eup %203 }
 0x1c6   :  { %162 = vmatmul.f32.vlgmr.msra.gmra.mxu3 %v204_v42 }
 0x249   :  { %v163_v43 = vpop.f32.mrf.mxu3 }
 0x24a   :  { %v164_v44 = vadd.f32 %v163_v43, %v85_v35 }
 0x24c   :  { %205 = vtanh.f32 %v164_v44 }
 0x252   :  { %v206_v45 = vpop.eup %205 }
 0x253   :  { %183 = vmatmul.f32.vlgmr.msrb.gmra.mxu0 %v206_v45 }
 0x2d0   :  { %v184_v46 = vpop.f32.mrf.mxu0 }
 0x2d1   :  { %v185_v47 = vadd.f32 %v184_v46, %v85_v35 }
 0x2d3   :  { %207 = vtanh.f32 %v185_v47 }
 0x2d9   :  { %v208_v48 = vpop.eup %207 }
 0x2da   :  { %188 = vst [vmem:[%s327_s4] sm:$0xff] %v208_v48 }
 0x2db   :  { %193 = vsyncpa [#allocation3], 1 }
 0x2dc   :  { %194 = vsyncpa [#allocation5], 1 }

</bundles_post_ra>
